<compile_context>
chip_gen: v6e
topology: v6e:2x2x1
jax: 0.10.0
libtpu: 0.0.40
codegen_flags: <defaults>
</compile_context>

<pallas_src>
import functools

import jax
import jax.numpy as jnp
from jax import lax
from jax.experimental import pallas as pl
from jax.experimental.pallas import tpu as pltpu


def _f1_weighted_kernel(p_ref, t_ref, out_ref, tp_acc, pred_acc, sup_acc,
                        *, n_rows: int, ragged: bool):
    """One (C, TILE_N) tile: class axis on sublanes, batch axis lane-dense."""
    i = pl.program_id(0)

    @pl.when(i == 0)
    def _init():
        tp_acc[...] = jnp.zeros_like(tp_acc)
        pred_acc[...] = jnp.zeros_like(pred_acc)
        sup_acc[...] = jnp.zeros_like(sup_acc)

    # Native-dtype DMA; cast to f32 on-chip (no-op for f32 inputs).
    p = p_ref[...].astype(jnp.float32)            # (C, T)
    t = t_ref[...].astype(jnp.float32)            # (C, T)
    C, T = p.shape

    c_iota = lax.broadcasted_iota(jnp.int32, (C, T), 0)

    def argmax_idx(x):
        # first-occurrence argmax along the (small) class/sublane axis
        mx = jnp.max(x, axis=0, keepdims=True)                       # (1, T)
        return jnp.min(jnp.where(x == mx, c_iota, C),
                       axis=0, keepdims=True)                        # (1, T)

    idx_p = argmax_idx(p)                                            # (1, T)
    idx_t = argmax_idx(t)                                            # (1, T)

    if ragged:
        # Padded columns of the last tile: push their index out of range (C)
        # so they match no class and drop out of every count below.
        col = lax.broadcasted_iota(jnp.int32, (1, T), 1)
        invalid = (i * T + col) >= n_rows                            # (1, T)
        idx_p = jnp.where(invalid, C, idx_p)
        idx_t = jnp.where(invalid, C, idx_t)

    p_oh = c_iota == idx_p                                           # (C, T) bool
    t_oh = c_iota == idx_t                                           # (C, T) bool
    tp_oh = jnp.logical_and(p_oh, idx_p == idx_t)                    # (C, T) bool

    one = jnp.float32(1.0)
    zero = jnp.float32(0.0)
    tp_acc[...] += jnp.sum(jnp.where(tp_oh, one, zero), axis=1, keepdims=True)
    pred_acc[...] += jnp.sum(jnp.where(p_oh, one, zero), axis=1, keepdims=True)
    sup_acc[...] += jnp.sum(jnp.where(t_oh, one, zero), axis=1, keepdims=True)

    @pl.when(i == pl.num_programs(0) - 1)
    def _finalize():
        tp = tp_acc[...]
        sup = sup_acc[...]
        denom = pred_acc[...] + sup                     # 2*TP + FP + FN
        denom_safe = jnp.where(denom > 0.0, denom, 1.0)
        f1 = jnp.where(denom > 0.0, 2.0 * tp / denom_safe, 0.0)      # (C, 1)
        out_ref[0, 0] = jnp.sum(sup * f1) / jnp.float32(n_rows)


def f1_weighted(preds: jax.Array, target: jax.Array, *,
                tile_n: int = 32768) -> jax.Array:
    """preds: (N, num_labels) logits; target: (N, num_labels) one-hot/scores."""
    preds = jnp.asarray(preds)
    target = jnp.asarray(target)
    assert preds.shape == target.shape and preds.ndim == 2
    assert tile_n > 0 and tile_n % 128 == 0
    N, C = preds.shape

    # Lane-dense layout: batch axis on the 128-lane dim, class axis on sublanes.
    p_t = preds.T                                   # (C, N), native dtype
    t_t = target.T

    # Largest tile that keeps double-buffered inputs within a small VMEM budget.
    itemsize = max(jnp.dtype(preds.dtype).itemsize, jnp.dtype(target.dtype).itemsize)
    vmem_budget = 8 * 1024 * 1024                   # bytes for 2 inputs x 2 buffers
    max_block = max(128, (vmem_budget // (4 * C * itemsize)) // 128 * 128)
    block_cols = min(tile_n, max_block)

    if N <= block_cols:
        block_n = N                                 # single full-extent block
        num_tiles = 1
        ragged = False
    else:
        block_n = block_cols                        # multiple of 128
        num_tiles = pl.cdiv(N, block_n)
        ragged = (N % block_n) != 0                 # mask only if actually ragged

    kernel = functools.partial(_f1_weighted_kernel, n_rows=N, ragged=ragged)

    out = pl.pallas_call(
        kernel,
        out_shape=jax.ShapeDtypeStruct((1, 1), jnp.float32),
        grid_spec=pltpu.PrefetchScalarGridSpec(
            num_scalar_prefetch=0,
            grid=(num_tiles,),
            in_specs=[
                pl.BlockSpec((C, block_n), lambda i: (0, i)),
                pl.BlockSpec((C, block_n), lambda i: (0, i)),
            ],
            out_specs=pl.BlockSpec(memory_space=pltpu.MemorySpace.SMEM),
            scratch_shapes=[
                pltpu.VMEM((C, 1), jnp.float32),   # TP per class
                pltpu.VMEM((C, 1), jnp.float32),   # predicted count per class
                pltpu.VMEM((C, 1), jnp.float32),   # support per class
            ],
        ),
        compiler_params=pltpu.CompilerParams(
            dimension_semantics=("arbitrary",),      # accumulator carried across grid
            vmem_limit_bytes=32 * 1024 * 1024,
        ),
    )(p_t, t_t)
    return out[0, 0]


def _f1_weighted_ref(preds, target):
    # pure-JAX reference mirroring torchmetrics F1Score(average='weighted')
    C = preds.shape[-1]
    p = jnp.argmax(preds, axis=-1)
    t = jnp.argmax(target, axis=-1)
    p_oh = jax.nn.one_hot(p, C, dtype=jnp.float32)
    t_oh = jax.nn.one_hot(t, C, dtype=jnp.float32)
    tp = jnp.sum(p_oh * t_oh, axis=0)
    pred_cnt = jnp.sum(p_oh, axis=0)
    support = jnp.sum(t_oh, axis=0)
    denom = pred_cnt + support
    f1 = jnp.where(denom > 0, 2.0 * tp / jnp.where(denom > 0, denom, 1.0), 0.0)
    return jnp.sum(support * f1) / preds.shape[0]


if __name__ == "__main__":
    key = jax.random.PRNGKey(0)
    k1, k2 = jax.random.split(key)

    N, NUM_LABELS = 200, 8     # N deliberately NOT a multiple of the tile size
    preds = jax.random.normal(k1, (N, NUM_LABELS), dtype=jnp.float32)
    labels = jax.random.randint(k2, (N,), 0, NUM_LABELS)
    target = jax.nn.one_hot(labels, NUM_LABELS, dtype=jnp.float32)

    ref = _f1_weighted_ref(preds, target)

    # Multi-tile grid with a ragged, masked last tile.
    score = f1_weighted(preds, target, tile_n=128)
    jax.block_until_ready(score)
    assert jnp.allclose(score, ref, atol=1e-6), (score, ref)

    # Default single-block fast path (whole batch fits one tile).
    score2 = f1_weighted(preds, target)
    jax.block_until_ready(score2)
    assert jnp.allclose(score2, ref, atol=1e-6), (score2, ref)

    print("KERNEL_OK")
</pallas_src>

<mosaic_0001>
module attributes {stable_mosaic.version = 11 : i64} {
  func.func @_f1_weighted_kernel(%arg0: i32, %arg1: memref<8x128xf32, #tpu.memory_space<vmem>>, %arg2: memref<8x128xf32, #tpu.memory_space<vmem>>, %arg3: memref<1x1xf32, #tpu.memory_space<smem>>, %arg4: memref<8x1xf32, #tpu.memory_space<vmem>>, %arg5: memref<8x1xf32, #tpu.memory_space<vmem>>, %arg6: memref<8x1xf32, #tpu.memory_space<vmem>>) attributes {dimension_semantics = [#tpu.dimension_semantics<arbitrary>], iteration_bounds = array<i64: 2>, scalar_prefetch = 0 : i64, scratch_operands = 3 : i64, tpu.core_type = #tpu.core_type<tc>, window_params = [{transform_indices = @transform_0, window_bounds = array<i64: 8, 128>}, {transform_indices = @transform_1, window_bounds = array<i64: 8, 128>}, {transform_indices = @transform_2, window_bounds = array<i64: 1, 1>}]} {
    %c0_i32 = arith.constant 0 : i32
    %0 = arith.cmpi eq, %arg0, %c0_i32 : i32
    %1 = arith.extui %0 : i1 to i32
    %c0_i32_0 = arith.constant 0 : i32
    %2 = arith.cmpi ne, %1, %c0_i32_0 : i32
    scf.if %2 {
      %cst_32 = arith.constant 0.000000e+00 : f32
      %66 = vector.broadcast %cst_32 : f32 to vector<8x1xf32>
      %c0_33 = arith.constant 0 : index
      %c0_34 = arith.constant 0 : index
      %67 = vector.load %arg4[%c0_33, %c0_34] : memref<8x1xf32, #tpu.memory_space<vmem>>, vector<8x1xf32>
      tpu.vector_store %arg4[%c0_33, %c0_34], %66 {strides = array<i32>} : memref<8x1xf32, #tpu.memory_space<vmem>>, vector<8x1xf32>,
      %cst_35 = arith.constant 0.000000e+00 : f32
      %68 = vector.broadcast %cst_35 : f32 to vector<8x1xf32>
      %c0_36 = arith.constant 0 : index
      %c0_37 = arith.constant 0 : index
      %69 = vector.load %arg5[%c0_36, %c0_37] : memref<8x1xf32, #tpu.memory_space<vmem>>, vector<8x1xf32>
      tpu.vector_store %arg5[%c0_36, %c0_37], %68 {strides = array<i32>} : memref<8x1xf32, #tpu.memory_space<vmem>>, vector<8x1xf32>,
      %cst_38 = arith.constant 0.000000e+00 : f32
      %70 = vector.broadcast %cst_38 : f32 to vector<8x1xf32>
      %c0_39 = arith.constant 0 : index
      %c0_40 = arith.constant 0 : index
      %71 = vector.load %arg6[%c0_39, %c0_40] : memref<8x1xf32, #tpu.memory_space<vmem>>, vector<8x1xf32>
      tpu.vector_store %arg6[%c0_39, %c0_40], %70 {strides = array<i32>} : memref<8x1xf32, #tpu.memory_space<vmem>>, vector<8x1xf32>,
    } else {
    }
    %c0 = arith.constant 0 : index
    %c0_1 = arith.constant 0 : index
    %3 = vector.load %arg1[%c0, %c0_1] : memref<8x128xf32, #tpu.memory_space<vmem>>, vector<8x128xf32>
    %c0_2 = arith.constant 0 : index
    %c0_3 = arith.constant 0 : index
    %4 = vector.load %arg2[%c0_2, %c0_3] : memref<8x128xf32, #tpu.memory_space<vmem>>, vector<8x128xf32>
    %5 = tpu.iota {dimensions = array<i32: 0>} : vector<8x128xi32>
    %cst = arith.constant dense<0xFF800000> : vector<128xf32>
    %6 = vector.multi_reduction <maximumf>, %3, %cst [0] : vector<8x128xf32> to vector<128xf32>
    %7 = vector.shape_cast %6 : vector<128xf32> to vector<1x128xf32>
    %8 = vector.broadcast %7 : vector<1x128xf32> to vector<8x128xf32>
    %9 = arith.cmpf oeq, %3, %8 : vector<8x128xf32>
    %c8_i32 = arith.constant 8 : i32
    %10 = vector.broadcast %c8_i32 : i32 to vector<8x128xi32>
    %11 = arith.select %9, %5, %10 : vector<8x128xi1>, vector<8x128xi32>
    %cst_4 = arith.constant dense<2147483647> : vector<128xi32>
    %12 = vector.multi_reduction <minsi>, %11, %cst_4 [0] : vector<8x128xi32> to vector<128xi32>
    %13 = vector.shape_cast %12 : vector<128xi32> to vector<1x128xi32>
    %cst_5 = arith.constant dense<0xFF800000> : vector<128xf32>
    %14 = vector.multi_reduction <maximumf>, %4, %cst_5 [0] : vector<8x128xf32> to vector<128xf32>
    %15 = vector.shape_cast %14 : vector<128xf32> to vector<1x128xf32>
    %16 = vector.broadcast %15 : vector<1x128xf32> to vector<8x128xf32>
    %17 = arith.cmpf oeq, %4, %16 : vector<8x128xf32>
    %c8_i32_6 = arith.constant 8 : i32
    %18 = vector.broadcast %c8_i32_6 : i32 to vector<8x128xi32>
    %19 = arith.select %17, %5, %18 : vector<8x128xi1>, vector<8x128xi32>
    %cst_7 = arith.constant dense<2147483647> : vector<128xi32>
    %20 = vector.multi_reduction <minsi>, %19, %cst_7 [0] : vector<8x128xi32> to vector<128xi32>
    %21 = vector.shape_cast %20 : vector<128xi32> to vector<1x128xi32>
    %22 = tpu.iota {dimensions = array<i32: 1>} : vector<1x128xi32>
    %c128_i32 = arith.constant 128 : i32
    %23 = arith.muli %arg0, %c128_i32 : i32
    %24 = vector.broadcast %23 : i32 to vector<1x128xi32>
    %25 = arith.addi %24, %22 : vector<1x128xi32>
    %c200_i32 = arith.constant 200 : i32
    %26 = vector.broadcast %c200_i32 : i32 to vector<1x128xi32>
    %27 = arith.cmpi sge, %25, %26 : vector<1x128xi32>
    %c8_i32_8 = arith.constant 8 : i32
    %28 = vector.broadcast %c8_i32_8 : i32 to vector<1x128xi32>
    %29 = arith.select %27, %28, %13 : vector<1x128xi1>, vector<1x128xi32>
    %c8_i32_9 = arith.constant 8 : i32
    %30 = vector.broadcast %c8_i32_9 : i32 to vector<1x128xi32>
    %31 = arith.select %27, %30, %21 : vector<1x128xi1>, vector<1x128xi32>
    %32 = vector.broadcast %29 : vector<1x128xi32> to vector<8x128xi32>
    %33 = arith.cmpi eq, %5, %32 : vector<8x128xi32>
    %34 = vector.broadcast %31 : vector<1x128xi32> to vector<8x128xi32>
    %35 = arith.cmpi eq, %5, %34 : vector<8x128xi32>
    %36 = arith.cmpi eq, %29, %31 : vector<1x128xi32>
    %37 = vector.broadcast %36 : vector<1x128xi1> to vector<8x128xi1>
    %38 = arith.andi %33, %37 : vector<8x128xi1>
    %c0_10 = arith.constant 0 : index
    %c0_11 = arith.constant 0 : index
    %39 = vector.load %arg4[%c0_10, %c0_11] : memref<8x1xf32, #tpu.memory_space<vmem>>, vector<8x1xf32>
    %cst_12 = arith.constant 1.000000e+00 : f32
    %cst_13 = arith.constant 0.000000e+00 : f32
    %40 = vector.broadcast %cst_12 : f32 to vector<8x128xf32>
    %41 = vector.broadcast %cst_13 : f32 to vector<8x128xf32>
    %42 = arith.select %38, %40, %41 : vector<8x128xi1>, vector<8x128xf32>
    %cst_14 = arith.constant dense<0.000000e+00> : vector<8xf32>
    %43 = vector.multi_reduction <add>, %42, %cst_14 [1] : vector<8x128xf32> to vector<8xf32>
    %44 = vector.shape_cast %43 : vector<8xf32> to vector<8x1xf32>
    %45 = arith.addf %39, %44 : vector<8x1xf32>
    %c0_15 = arith.constant 0 : index
    %c0_16 = arith.constant 0 : index
    %46 = vector.load %arg4[%c0_15, %c0_16] : memref<8x1xf32, #tpu.memory_space<vmem>>, vector<8x1xf32>
    tpu.vector_store %arg4[%c0_15, %c0_16], %45 {strides = array<i32>} : memref<8x1xf32, #tpu.memory_space<vmem>>, vector<8x1xf32>,
    %c0_17 = arith.constant 0 : index
    %c0_18 = arith.constant 0 : index
    %47 = vector.load %arg5[%c0_17, %c0_18] : memref<8x1xf32, #tpu.memory_space<vmem>>, vector<8x1xf32>
    %cst_19 = arith.constant 1.000000e+00 : f32
    %cst_20 = arith.constant 0.000000e+00 : f32
    %48 = vector.broadcast %cst_19 : f32 to vector<8x128xf32>
    %49 = vector.broadcast %cst_20 : f32 to vector<8x128xf32>
    %50 = arith.select %33, %48, %49 : vector<8x128xi1>, vector<8x128xf32>
    %cst_21 = arith.constant dense<0.000000e+00> : vector<8xf32>
    %51 = vector.multi_reduction <add>, %50, %cst_21 [1] : vector<8x128xf32> to vector<8xf32>
    %52 = vector.shape_cast %51 : vector<8xf32> to vector<8x1xf32>
    %53 = arith.addf %47, %52 : vector<8x1xf32>
    %c0_22 = arith.constant 0 : index
    %c0_23 = arith.constant 0 : index
    %54 = vector.load %arg5[%c0_22, %c0_23] : memref<8x1xf32, #tpu.memory_space<vmem>>, vector<8x1xf32>
    tpu.vector_store %arg5[%c0_22, %c0_23], %53 {strides = array<i32>} : memref<8x1xf32, #tpu.memory_space<vmem>>, vector<8x1xf32>,
    %c0_24 = arith.constant 0 : index
    %c0_25 = arith.constant 0 : index
    %55 = vector.load %arg6[%c0_24, %c0_25] : memref<8x1xf32, #tpu.memory_space<vmem>>, vector<8x1xf32>
    %cst_26 = arith.constant 1.000000e+00 : f32
    %cst_27 = arith.constant 0.000000e+00 : f32
    %56 = vector.broadcast %cst_26 : f32 to vector<8x128xf32>
    %57 = vector.broadcast %cst_27 : f32 to vector<8x128xf32>
    %58 = arith.select %35, %56, %57 : vector<8x128xi1>, vector<8x128xf32>
    %cst_28 = arith.constant dense<0.000000e+00> : vector<8xf32>
    %59 = vector.multi_reduction <add>, %58, %cst_28 [1] : vector<8x128xf32> to vector<8xf32>
    %60 = vector.shape_cast %59 : vector<8xf32> to vector<8x1xf32>
    %61 = arith.addf %55, %60 : vector<8x1xf32>
    %c0_29 = arith.constant 0 : index
    %c0_30 = arith.constant 0 : index
    %62 = vector.load %arg6[%c0_29, %c0_30] : memref<8x1xf32, #tpu.memory_space<vmem>>, vector<8x1xf32>
    tpu.vector_store %arg6[%c0_29, %c0_30], %61 {strides = array<i32>} : memref<8x1xf32, #tpu.memory_space<vmem>>, vector<8x1xf32>,
    %c1_i32 = arith.constant 1 : i32
    %63 = arith.cmpi eq, %arg0, %c1_i32 : i32
    %64 = arith.extui %63 : i1 to i32
    %c0_i32_31 = arith.constant 0 : i32
    %65 = arith.cmpi ne, %64, %c0_i32_31 : i32
    scf.if %65 {
      %c0_32 = arith.constant 0 : index
      %c0_33 = arith.constant 0 : index
      %66 = vector.load %arg4[%c0_32, %c0_33] : memref<8x1xf32, #tpu.memory_space<vmem>>, vector<8x1xf32>
      %c0_34 = arith.constant 0 : index
      %c0_35 = arith.constant 0 : index
      %67 = vector.load %arg6[%c0_34, %c0_35] : memref<8x1xf32, #tpu.memory_space<vmem>>, vector<8x1xf32>
      %c0_36 = arith.constant 0 : index
      %c0_37 = arith.constant 0 : index
      %68 = vector.load %arg5[%c0_36, %c0_37] : memref<8x1xf32, #tpu.memory_space<vmem>>, vector<8x1xf32>
      %69 = arith.addf %68, %67 : vector<8x1xf32>
      %cst_38 = arith.constant 0.000000e+00 : f32
      %70 = vector.broadcast %cst_38 : f32 to vector<8x1xf32>
      %71 = arith.cmpf ogt, %69, %70 : vector<8x1xf32>
      %cst_39 = arith.constant 1.000000e+00 : f32
      %72 = vector.broadcast %cst_39 : f32 to vector<8x1xf32>
      %73 = arith.select %71, %69, %72 : vector<8x1xi1>, vector<8x1xf32>
      %cst_40 = arith.constant 0.000000e+00 : f32
      %74 = vector.broadcast %cst_40 : f32 to vector<8x1xf32>
      %75 = arith.cmpf ogt, %69, %74 : vector<8x1xf32>
      %cst_41 = arith.constant 2.000000e+00 : f32
      %76 = vector.broadcast %cst_41 : f32 to vector<8x1xf32>
      %77 = arith.mulf %76, %66 : vector<8x1xf32>
      %78 = arith.divf %77, %73 : vector<8x1xf32>
      %cst_42 = arith.constant 0.000000e+00 : f32
      %79 = vector.broadcast %cst_42 : f32 to vector<8x1xf32>
      %80 = arith.select %75, %78, %79 : vector<8x1xi1>, vector<8x1xf32>
      %81 = arith.mulf %67, %80 : vector<8x1xf32>
      %82 = vector.shape_cast %81 : vector<8x1xf32> to vector<1x8x1xf32>
      %cst_43 = arith.constant dense<0.000000e+00> : vector<1xf32>
      %83 = vector.multi_reduction <add>, %82, %cst_43 [1, 2] : vector<1x8x1xf32> to vector<1xf32>
      %84 = vector.shape_cast %83 : vector<1xf32> to vector<1x1x1xf32>
      %85 = vector.extract %84[0, 0, 0] : f32 from vector<1x1x1xf32>
      %cst_44 = arith.constant 2.000000e+02 : f32
      %86 = arith.divf %85, %cst_44 : f32
      %c0_45 = arith.constant 0 : index
      %c0_46 = arith.constant 0 : index
      %87 = memref.load %arg3[%c0_45, %c0_46] : memref<1x1xf32, #tpu.memory_space<smem>>
      memref.store %86, %arg3[%c0_45, %c0_46] : memref<1x1xf32, #tpu.memory_space<smem>>
    } else {
    }
    return
  }
  func.func @transform_0(%arg0: i32) -> (i32, i32) {
    %c0_i32 = arith.constant 0 : i32
    %c0_i32_0 = arith.constant 0 : i32
    return %c0_i32, %arg0 : i32, i32
  }
  func.func @transform_1(%arg0: i32) -> (i32, i32) {
    %c0_i32 = arith.constant 0 : i32
    %c0_i32_0 = arith.constant 0 : i32
    return %c0_i32, %arg0 : i32, i32
  }
  func.func @transform_2(%arg0: i32) -> (i32, i32) {
    %c0_i32 = arith.constant 0 : i32
    %c0_i32_0 = arith.constant 0 : i32
    %c0_i32_1 = arith.constant 0 : i32
    return %c0_i32, %c0_i32_0 : i32, i32
  }
}

</mosaic_0001>

<bundles_post_ra>
// kernel: tpu_custom_call.1
= control target key start
LH: loop header
LB: loop body
LE: loop exit
PB: predicated region body
PF: predicated region fallthrough
CT: control target
= control target key end

     0   :  { %7 = vsyncpa [#allocation6], 0  ;;  %s734_s0 = inlined_call_operand.hbm [shape: f32[8,200], index: 0, kind: input, shape index: {}]   ;;  %s735_s1 = inlined_call_operand.hbm [shape: f32[8,200], index: 1, kind: input, shape index: {}]   ;;  %s736_s2 = inlined_call_operand.hbm [shape: f32[1,1], index: 2, kind: output, shape index: {}]  }
   0x1   :  { %9 = vsyncpa [#allocation6 + $0x1], 0 }
   0x2   :  { %10 = vsyncpa [#allocation9], 0 }
   0x3   :  { %12 = vsyncpa [#allocation9 + $0x1], 0 }
   0x4   :  { %13 = vsyncpa [#allocation7], 0  ;;  %s576_s9 = smov 0   ;;  %s578_s10 = smov 0  }
   0x5   :  { %s580_s11 = smov 0   ;;  %s582_s12 = smov 0  }
   0x6 LB: > { %s595_s13 = sadd.s32 4294967295, %s554_s12   ;;  %s598_s14 = sadd.s32 1, %s554_s12   ;;  %s554_s12 = sphi %s582_s12, %s748_s12   ;;  %s550_s11 = sphi %s580_s11, %s747_s11   ;;  %s546_s10 = sphi %s578_s10, %s746_s10   ;;  %s542_s9 = sphi %s576_s9, %s745_s9  }
   0x7   : > { %s23_s15 = ssub.s32 %s554_s12, %s598_s14  ;;  %s26_s16 = sadd.s32 1, %s550_s11 }
   0x8   : > { %p24_p0 = scmp.eq.s32.totalorder %s23_s15, 0  ;;  %p33_p1 = scmp.ne.s32.totalorder %s550_s11, %s546_s10 }
   0x9   : > { %p34_p2 = scmp.eq.s32.totalorder %s554_s12, 0  ;;  %p39_p3 = scmp.ne.s32.totalorder %s546_s10, %s542_s9 }
   0xa   : > { %s608_s17 = scalar_select %p24_p0, %s550_s11, %s26_s16  }
   0xb   : > { %p35_p4 = por %p34_p2, %p33_p1  ;;  %p40_p5 = scmp.eq.s32.totalorder %s595_s13, 0 }
   0xc   : > { %p406_p6 = scmp.lt.s32.totalorder %s554_s12, 2  ;;  %s617_s19 = sand.u32 1, %s550_s11  }
   0xd   : > { %p612_p7 = por %p40_p5, %p39_p3  ;;  %s375_s20 = sshll.u32 %s617_s19, 3 }
   0xe   : > { %s376_s21 = sshll.u32 %s554_s12, 7  ;;  %s114_s25 = scalar_lea.vmem [#allocation5], %s375_s20 }
   0xf   : > { %s738_s18 = scalar_select %p612_p7, 1, 0 }
  0x10   : > { %s626_s24 = scalar_lea.hbm %s734_s0, %s376_s21  ;;  %s121_s26 = sshll.u32 %s114_s25, 4  ;;  %s630_s26 = int_to_ptr.vmem [resolvable:$true] %s121_s26 }
  0x11   : > { %p632_p8 = pnand %p406_p6, %p35_p4  ;;  %s111_s28 = scalar_lea.sflag [#allocation6], %s617_s19 }
  0x12   : > { %s446_s29 = scalar_lea.hbm %s626_s24, 128  ;;  %s451_s4 = scalar_lea.hbm %s734_s0, 256 }
  0x13   : > { %p447_p11 = scmp.ne.s32.totalorder %s626_s24, %s446_s29  ;;  %p448_p12 = pneg %p632_p8 }
  0x14   : > { %p452_p1 = scmp.lt.s32.totalorder %s626_s24, %s734_s0  ;;  %p453_p2 = scmp.lt.s32.totalorder %s451_s4, %s446_s29 }
  0x15   : > { %p449_p13 = pnand %p448_p12, %p447_p11 }
  0x16   : > { %p454_p3 = por %p453_p2, %p452_p1 }
  0x17   : > { %p450_p0 = pneg %p449_p13 }
  0x19   : > { %p455_p4 = pnand %p454_p3, %p450_p0 }
  0x1b   : > { %458 = shalt.err (!%p455_p4)
}
  0x1c   : > { %s459_s7 = scalar_lea.vmem %s630_s26, 128  ;;  %s556_s8 = smov [#allocation5]  }
  0x1d   : > { %p460_p5 = scmp.ne.s32.totalorder %s630_s26, %s459_s7  ;;  %s464_s9 = sshll.u32 %s556_s8, 4  ;;  %s465_s9 = int_to_ptr.vmem [resolvable:$false] %s464_s9 }
  0x1e   : > { %s466_s15 = scalar_lea.vmem %s465_s9, 256  ;;  %p467_p13 = scmp.lt.s32.totalorder %s630_s26, %s465_s9 }
  0x1f   : > { %p462_p6 = pnand %p460_p5, %p448_p12  ;;  %p468_p9 = scmp.lt.s32.totalorder %s466_s15, %s459_s7 }
  0x21   : > { %p463_p11 = pneg %p462_p6  ;;  %p469_p10 = por %p468_p9, %p467_p13 }
  0x23   : > { %p470_p1 = pnand %p469_p10, %p463_p11 }
  0x25   : > { %473 = shalt.err (!%p470_p1)
}
  0x26   : > { %402 = dma.hbm_to_vmem [thread:$0]  (!%p632_p8), %s626_s24, 128, %s630_s26, %s111_s28  }
  0x27   : > { %p740_p0 = scmp.lt.s32.totalorder %s554_s12, 3  ;;  %p741_p2 = scmp.ge.s32.totalorder %s554_s12, 1 }
  0x28   : > { %s676_s25 = scalar_lea.hbm %s735_s1, %s376_s21  ;;  %s132_s29 = scalar_lea.vmem [#allocation8], %s375_s20 }
  0x29   : > { %p667_p3 = pnand %p741_p2, %p740_p0  ;;  %s139_s30 = sshll.u32 %s132_s29, 4  ;;  %s140_s30 = int_to_ptr.vmem [resolvable:$true] %s139_s30 }
  0x2a   : > { %s129_s24 = scalar_lea.sflag [#allocation9], %s617_s19  ;;  %s474_s26 = scalar_lea.hbm %s676_s25, 128 }
  0x2b   : > { %s742_s16 = scalar_select %p667_p3, 1, 0 }
  0x2c   : > { %p475_p9 = scmp.ne.s32.totalorder %s676_s25, %s474_s26  ;;  %s479_s3 = scalar_lea.hbm %s735_s1, 256 }
  0x2d   : > { %p480_p5 = scmp.lt.s32.totalorder %s676_s25, %s735_s1  ;;  %p481_p6 = scmp.lt.s32.totalorder %s479_s3, %s474_s26 }
  0x2e   : > { %p477_p10 = pnand %p475_p9, %p448_p12 }
  0x2f   : > { %p482_p11 = por %p481_p6, %p480_p5 }
  0x30   : > { %p478_p4 = pneg %p477_p10 }
  0x32   : > { %p483_p13 = pnand %p482_p11, %p478_p4 }
  0x34   : > { %486 = shalt.err (!%p483_p13)
}
  0x35   : > { %s487_s20 = scalar_lea.vmem %s140_s30, 128  ;;  %s557_s19 = smov [#allocation8]  }
  0x36   : > { %p488_p1 = scmp.ne.s32.totalorder %s140_s30, %s487_s20  ;;  %s492_s5 = sshll.u32 %s557_s19, 4  ;;  %s493_s5 = int_to_ptr.vmem [resolvable:$false] %s492_s5 }
  0x37   : > { %s494_s6 = scalar_lea.vmem %s493_s5, 256  ;;  %p495_p9 = scmp.lt.s32.totalorder %s140_s30, %s493_s5 }
  0x38   : > { %p490_p0 = pnand %p488_p1, %p448_p12  ;;  %p496_p10 = scmp.lt.s32.totalorder %s494_s6, %s487_s20 }
  0x3a   : > { %p491_p2 = pneg %p490_p0  ;;  %p497_p7 = por %p496_p10, %p495_p9 }
  0x3c   : > { %p498_p3 = pnand %p497_p7, %p491_p2 }
  0x3e   : > { %501 = shalt.err (!%p498_p3)
}
  0x3f   : > { %405 = dma.hbm_to_vmem [thread:$0]  (!%p632_p8), %s676_s25, 128, %s140_s30, %s129_s24  }
  0x40   : > { %p743_p4 = scmp.ne.s32.totalorder %s742_s16, 0 }
  0x41   : > { %s150_s7 = sand.u32 (!%p743_p4), 1, %s546_s10   ;;  %p744_p12 = scmp.ne.s32.totalorder (!%p743_p4), %s738_s18, 0 }
  0x42   : > { %148 = sbr.rel (%p743_p4) target bundleno = 500 (0x1f4), region = 28  ;;  %s380_s8 = sshll.u32 (!%p743_p4), %s150_s7, 3 }
  0x43   : > { %s151_s9 = scalar_lea.sflag (!%p743_p4), [#allocation6], %s150_s7  ;;  %s154_s15 = scalar_lea.vmem (!%p743_p4), [#allocation5], %s380_s8 }
  0x47   : > { %529 = dma.done.wait (%p744_p12), %s151_s9, 128  }
  0x48   : > { %531 = vsyncadd (%p744_p12), %s151_s9, 4294967168  ;;  %s160_s22 = scalar_lea.sflag [#allocation9], %s150_s7  ;;  %s163_s23 = scalar_lea.vmem [#allocation8], %s380_s8 }
  0x49   : > { %533 = dma.done.wait (%p744_p12), %s160_s22, 128  }
  0x4a   : > { %535 = vsyncadd (%p744_p12), %s160_s22, 4294967168  ;;  %p382_p7 = scmp.ne.s32.totalorder %s595_s13, 0 }
  0x4c   : > { %187 = sbr.rel (%p382_p7) target bundleno = 84 (0x54), region = 40 }
  0x51   : > { %vm188_vm0 = vcmask 7168   ;;  %v558_v0 = vmov 0.0  }
  0x52   : > { %189 = vst.msk [vmem:[#allocation2] sm:$0xff] %vm188_vm0, %v558_v0  ;;  %190 = vst.msk [vmem:[#allocation3] sm:$0xff] %vm188_vm0, %v558_v0 }
  0x53   : > { %191 = vst.msk [vmem:[#allocation4] sm:$0xff] %vm188_vm0, %v558_v0 }
  0x54 PF: > { %v192_v1 = vld [vmem:[%s154_s15] sm:$0xff]  ;;  %v193_v2 = vld [vmem:[%s163_s23] sm:$0xff]  ;;  %v194_v9 = vlaneseq  ;;  %s383_s18 = sshll.u32 %s595_s13, 7  ;;  %v559_v36 = vmov 0.0   ;;  %vm249_vm14 = vcmask 7168   ;;  %p384_p8 = scmp.ne.s32.totalorder %s595_s13, 1 }
  0x55   : > { %v196_v3 = vrot.slane %v192_v1, 4  ;;  %v213_v4 = vrot.slane %v193_v2, 4  ;;  %v233_v22 = vstv %s383_s18 }
  0x56   : > { %v195_v14 = vshrl.u32 %v194_v9, 7  ;;  %v231_v21 = vand.u32 127, %v194_v9 }
  0x57   : > { %v197_v5 = vmax.f32 %v192_v1, %v196_v3  ;;  %v214_v6 = vmax.f32 %v193_v2, %v213_v4 }
  0x58   : > { %v234_v27 = vadd.s32 %v233_v22, %v231_v21 }
  0x59   : > { %v198_v7 = vrot.slane %v197_v5, 2  ;;  %v215_v8 = vrot.slane %v214_v6, 2  ;;  %v244_v41 = vld [vmem:[#allocation2] sm:$0xff]  ;;  %v251_v46 = vld [vmem:[#allocation3] sm:$0xff] }
  0x5a   : > { %vm235_vm7 = vcmp.ge.s32.totalorder %v234_v27, 200  ;;  %v257_v40 = vld [vmem:[#allocation4] sm:$0xff] }
  0x5b   : > { %v199_v10 = vmax.f32 %v197_v5, %v198_v7  ;;  %v216_v11 = vmax.f32 %v214_v6, %v215_v8 }
  0x5d   : > { %v200_v12 = vrot.slane %v199_v10, 1  ;;  %v217_v13 = vrot.slane %v216_v11, 1 }
  0x5f   : > { %v201_v15 = vmax.f32 %v199_v10, %v200_v12  ;;  %v218_v16 = vmax.f32 %v216_v11, %v217_v13 }
  0x61   : > { %vm202_vm1 = vcmp.eq.f32.partialorder %v192_v1, %v201_v15  ;;  %vm219_vm2 = vcmp.eq.f32.partialorder %v193_v2, %v218_v16 }
  0x62   : > { %v203_v17 = vsel %vm202_vm1, %v195_v14, 8  ;;  %v220_v18 = vsel %vm219_vm2, %v195_v14, 8 }
  0x63   : > { %v204_v19 = vrot.slane %v203_v17, 4  ;;  %v221_v20 = vrot.slane %v220_v18, 4 }
  0x65   : > { %vm205_vm3 = vcmp.lt.s32.totalorder %v203_v17, %v204_v19  ;;  %vm222_vm4 = vcmp.lt.s32.totalorder %v220_v18, %v221_v20 }
  0x66   : > { %v206_v23 = vsel %vm205_vm3, %v203_v17, %v204_v19  ;;  %v223_v24 = vsel %vm222_vm4, %v220_v18, %v221_v20 }
  0x67   : > { %v207_v25 = vrot.slane %v206_v23, 2  ;;  %v224_v26 = vrot.slane %v223_v24, 2 }
  0x69   : > { %vm208_vm5 = vcmp.lt.s32.totalorder %v206_v23, %v207_v25  ;;  %vm225_vm6 = vcmp.lt.s32.totalorder %v223_v24, %v224_v26 }
  0x6a   : > { %v209_v28 = vsel %vm208_vm5, %v206_v23, %v207_v25  ;;  %v226_v29 = vsel %vm225_vm6, %v223_v24, %v224_v26 }
  0x6b   : > { %v210_v30 = vrot.slane %v209_v28, 1  ;;  %v227_v31 = vrot.slane %v226_v29, 1 }
  0x6d   : > { %vm211_vm8 = vcmp.lt.s32.totalorder %v209_v28, %v210_v30  ;;  %vm228_vm9 = vcmp.lt.s32.totalorder %v226_v29, %v227_v31 }
  0x6e   : > { %v212_v32 = vsel %vm211_vm8, %v209_v28, %v210_v30  ;;  %v229_v33 = vsel %vm228_vm9, %v226_v29, %v227_v31 }
  0x6f   : > { %v236_v34 = vsel %vm235_vm7, 8, %v212_v32  ;;  %v237_v35 = vsel %vm235_vm7, 8, %v229_v33 }
  0x70   : > { %vm238_vm10 = vcmp.eq.s32.totalorder %v195_v14, %v236_v34  ;;  %vm240_vm11 = vcmp.eq.s32.totalorder %v236_v34, %v237_v35  ;;  %vm239_vm12 = vcmp.eq.s32.totalorder %v195_v14, %v237_v35 }
  0x71   : > { %vm243_vm13 = vmand %vm238_vm10, %vm240_vm11  ;;  %v258_v37 = vsel %vm239_vm12, 1.0, %v559_v36  ;;  %v252_v39 = vsel %vm238_vm10, 1.0, %v559_v36 }
  0x72   : > { %v245_v38 = vsel %vm243_vm13, 1.0, %v559_v36  ;;  %259 = vadd.xlane.f32.xlu1 %v258_v37 }
  0x73   : > { %246 = vadd.xlane.f32.xlu0 %v245_v38 }
  0x77   : > { %253 = vadd.xlane.f32.xlu0 %v252_v39 }
  0xfb   : > { %v260_v42 = vpop.xlane.xlu1 %259 }
  0xfc   : > { %v247_v43 = vpop.xlane.xlu0 %246  ;;  %v261_v44 = vadd.f32 %v260_v42, %v257_v40 }
  0xfd   : > { %v248_v45 = vadd.f32 %v247_v43, %v244_v41 }
  0xfe   : > { %262 = vst.msk [vmem:[#allocation4] sm:$0xff] %vm249_vm14, %v261_v44 }
  0xff   : > { %250 = vst.msk [vmem:[#allocation2] sm:$0xff] %vm249_vm14, %v248_v45  ;;  %266 = sbr.rel (%p384_p8) target bundleno = 494 (0x1ee), region = 44 }
 0x100   : > { %v254_v47 = vpop.xlane.xlu0 %253 }
 0x101   : > { %v255_v48 = vadd.f32 %v254_v47, %v251_v46 }
 0x103   : > { %256 = vst.msk [vmem:[#allocation3] sm:$0xff] %vm249_vm14, %v255_v48 }
 0x105   : > { %v268_v49 = vld [vmem:[#allocation4] sm:$0xff] }
 0x106   : > { %v267_v53 = vld [vmem:[#allocation2] sm:$0xff] }
 0x107   : > { %v273_v54 = vmul.f32 2.0, %v267_v53 }
 0x10a   : > { %v269_v50 = vld [vmem:[#allocation3] sm:$0xff] }
 0x10b   : > { %v270_v51 = vadd.f32 %v269_v50, %v268_v49 }
 0x10d   : > { %vm271_vm15 = vcmp.gt.f32.partialorder %v270_v51, 0.0 }
 0x10e   : > { %v272_v52 = vsel %vm271_vm15, %v270_v51, 1.0 }
 0x10f   : > { %444 = vrcp.f32 %v272_v52 }
 0x11c   : > { %v445_v55 = vpop.eup %444 }
 0x11d   : > { %v275_v56 = vmul.f32 %v445_v55, %v273_v54 }
 0x11f   : > { %v276_v57 = vsel %vm271_vm15, %v275_v56, 0.0 }
 0x120   : > { %v277_v58 = vmul.f32 %v276_v57, %v268_v49 }
 0x122   : > { %v278_v59 = vsel %vm249_vm14, %v277_v58, 0.0 }
 0x123   : > { %279 = vadd.xlane.f32.xlu0 %v278_v59 }
 0x1ac   : > { %v280_v60 = vpop.xlane.xlu0 %279 }
 0x1ad   : > { %v281_v61 = vrot.slane %v280_v60, 4 }
 0x1af   : > { %v282_v62 = vadd.f32 %v281_v61, %v280_v60 }
 0x1b1   : > { %v283_v63 = vrot.slane %v282_v62, 2 }
 0x1b3   : > { %v284_v0 = vadd.f32 %v283_v63, %v282_v62 }
 0x1b5   : > { %v285_v1 = vrot.slane %v284_v0, 1 }
 0x1b7   : > { %v286_v2 = vadd.f32 %v285_v1, %v284_v0 }
 0x1b9   : > { %389 = vpush %v286_v2 }
 0x1ea   : > { %s390_s27 = spop %389 }
 0x1eb   : > { %s290_s16 = smul.f32 0.005, %s390_s27 }
 0x1ed   : > { %292 = sst [smem:[#allocation10]] %s290_s16 }
 0x1ee PF: > { %p407_p3 = scmp.eq.s32.totalorder %s595_s13, 1  ;;  %s560_s25 = smov [#allocation10]  }
 0x1f0   : > { %396 = dma.smem_to_hbm (%p407_p3), %s560_s25, 16, %s736_s2, [#allocation7]  }
 0x1f1   : > { %537 = dma.done.wait (%p407_p3), [#allocation7], 16  }
 0x1f2   : > { %539 = vsyncadd (%p407_p3), [#allocation7], 4294967280 }
 0x1f3   : > { %306 = sfence }
 0x1f4 PF: > { %p16_p5 = scmp.ge.s32.totalorder %s598_s14, 4   ;;  %s745_s9 = smov %s546_s10 }
 0x1f5   : > { %s746_s10 = smov %s550_s11  ;;  %s747_s11 = smov %s608_s17 }
 0x1f6   : > { %s748_s12 = smov %s598_s14  ;;  %18 = sbr.rel (!%p16_p5) target bundleno = 6 (0x6), region = 87 }
 0x1fb   :  { %312 = vsyncpa [#allocation6], 1 }
 0x1fc   :  { %314 = vsyncpa [#allocation6 + $0x1], 1 }
 0x1fd   :  { %315 = vsyncpa [#allocation9], 1 }
 0x1fe   :  { %317 = vsyncpa [#allocation9 + $0x1], 1 }
 0x1ff   :  { %318 = vsyncpa [#allocation7], 1 }
 0x200   :  { %320 = vsyncpa [#allocation7 + $0x1], 1 }

</bundles_post_ra>
